<compile_context>
chip_gen: v6e
topology: v6e:2x2x1
jax: 0.10.0
libtpu: 0.0.40
codegen_flags: <defaults>
</compile_context>

<pallas_src>
import jax
import jax.numpy as jnp
from jax.experimental import pallas as pl
from jax.experimental.pallas import tpu as pltpu

INPUT_DIM = 20
HIDDEN_DIM = 150
OUTPUT_DIM = 5

# ---- packed-slab layout (rows x 256 lanes) ------------------------------------
PAD_HIDDEN = 256            # 150 -> next multiple of 128 (holds the +1 "ones" col)
OUT_LANES = 128             # lane-dense output width (real outputs in cols 0..4)
ONE_COL = HIDDEN_DIM        # column 150 carries the constant 1.0 used to fold biases


def _round_up(n, m):
    return (n + m - 1) // m * m


B1_ROW = INPUT_DIM                                # row 20: bias of layer 1 (+ 1.0 at col 150)
W2_ROW = _round_up(INPUT_DIM + 1, 8)              # 24: layer-2 weights start (sublane aligned)
B2_ROW = W2_ROW + HIDDEN_DIM                      # 174: layer-2 bias row (folded via ones col)
W3_ROW = W2_ROW + PAD_HIDDEN                      # 280: layer-3 weights start
B3_ROW = W3_ROW + HIDDEN_DIM                      # 430: layer-3 bias row (folded via ones col)
TOTAL_ROWS = W3_ROW + PAD_HIDDEN                  # 536 (multiple of 8)


def _mlp_kernel(x_ref, p_ref, out_ref):
    """x: (RB, 20) f32; p: (536, 256) packed params; out: (RB, 128) f32."""
    cdt = p_ref.dtype                                   # compute dtype of the MXU inputs (bf16)
    x = x_ref[...].astype(cdt)                          # (RB, 20)

    # Layer 1: y = x @ W1 + b1 ; b1 row also plants the constant 1.0 at col 150.
    w1 = p_ref[0:INPUT_DIM, :]                          # (20, 256)
    b1 = p_ref[B1_ROW:B1_ROW + 1, :].astype(jnp.float32)
    h1 = jnp.maximum(
        jnp.dot(x, w1, preferred_element_type=jnp.float32) + b1, 0.0)   # (RB, 256), h1[:,150]==1

    # Layer 2: bias folded in (row 174 of the slab multiplies h1[:,150]==1).
    w2 = p_ref[W2_ROW:W2_ROW + PAD_HIDDEN, :]           # (256, 256), zero-padded rows
    h2 = jnp.maximum(
        jnp.dot(h1.astype(cdt), w2, preferred_element_type=jnp.float32), 0.0)  # (RB, 256)

    # Layer 3: bias folded in; only the first 128 lanes are produced (lane-dense store).
    w3 = p_ref[W3_ROW:W3_ROW + PAD_HIDDEN, 0:OUT_LANES]  # (256, 128)
    out = jnp.dot(h2.astype(cdt), w3, preferred_element_type=jnp.float32)      # (RB, 128)
    out_ref[...] = out.astype(out_ref.dtype)


def pack_params(params, dtype=jnp.bfloat16):
    """Pack (w1,b1,w2,b2,w3,b3) -- weights stored (in,out) -- into one padded slab."""
    w1, b1, w2, b2, w3, b3 = params
    P = jnp.zeros((TOTAL_ROWS, PAD_HIDDEN), jnp.float32)
    P = P.at[0:INPUT_DIM, 0:HIDDEN_DIM].set(w1)
    P = P.at[B1_ROW, 0:HIDDEN_DIM].set(b1.reshape(-1))
    P = P.at[B1_ROW, ONE_COL].set(1.0)                  # makes h1[:,150] == 1
    P = P.at[W2_ROW:W2_ROW + HIDDEN_DIM, 0:HIDDEN_DIM].set(w2)
    P = P.at[B2_ROW, 0:HIDDEN_DIM].set(b2.reshape(-1))
    P = P.at[B2_ROW, ONE_COL].set(1.0)                  # keeps h2[:,150] == 1
    P = P.at[W3_ROW:W3_ROW + HIDDEN_DIM, 0:OUTPUT_DIM].set(w3)
    P = P.at[B3_ROW, 0:OUTPUT_DIM].set(b3.reshape(-1))
    return P.astype(dtype)


def net_forward(x, packed, *, block_rows=8):
    """x: (N, INPUT_DIM) f32 -> (N, OUTPUT_DIM) f32.

    Grid iterates over row-chunks of x; the packed-parameter BlockSpec has a
    constant index_map so the weights are DMA'd once and stay VMEM-resident.
    """
    N = x.shape[0]
    pad = (-N) % block_rows
    if pad:
        x = jnp.pad(x, ((0, pad), (0, 0)))
    Np = N + pad
    steps = Np // block_rows

    flops = 2 * Np * (INPUT_DIM * HIDDEN_DIM + HIDDEN_DIM * HIDDEN_DIM
                      + HIDDEN_DIM * OUTPUT_DIM)
    bytes_accessed = (Np * INPUT_DIM * 4
                      + packed.size * packed.dtype.itemsize
                      + Np * OUT_LANES * 4)

    grid_spec = pltpu.PrefetchScalarGridSpec(
        num_scalar_prefetch=0,
        grid=(steps,),
        in_specs=[
            pl.BlockSpec((block_rows, INPUT_DIM), lambda i: (i, 0)),    # x chunk per step
            pl.BlockSpec((TOTAL_ROWS, PAD_HIDDEN), lambda i: (0, 0)),   # weights: resident
        ],
        out_specs=pl.BlockSpec((block_rows, OUT_LANES), lambda i: (i, 0)),
    )

    out = pl.pallas_call(
        _mlp_kernel,
        out_shape=jax.ShapeDtypeStruct((Np, OUT_LANES), jnp.float32),
        grid_spec=grid_spec,
        compiler_params=pltpu.CompilerParams(dimension_semantics=("parallel",)),
        cost_estimate=pl.CostEstimate(flops=flops, transcendentals=0,
                                      bytes_accessed=bytes_accessed),
    )(x, packed)

    return out[:N, :OUTPUT_DIM]


def init_params(key):
    """Deterministic parameter init (PyTorch-like uniform). Weights stored (in, out)."""
    k1, k2, k3, k4, k5, k6 = jax.random.split(key, 6)

    def lin(kw, kb, fan_in, fan_out):
        bound = 1.0 / jnp.sqrt(fan_in)
        w = jax.random.uniform(kw, (fan_in, fan_out), jnp.float32, -bound, bound)
        b = jax.random.uniform(kb, (1, fan_out), jnp.float32, -bound, bound)
        return w, b

    w1, b1 = lin(k1, k2, INPUT_DIM, HIDDEN_DIM)
    w2, b2 = lin(k3, k4, HIDDEN_DIM, HIDDEN_DIM)
    w3, b3 = lin(k5, k6, HIDDEN_DIM, OUTPUT_DIM)
    return (w1, b1, w2, b2, w3, b3)


def reference_forward(x, params):
    """Full-precision spec reference (original f32 weights)."""
    w1, b1, w2, b2, w3, b3 = params
    h1 = jnp.maximum(x @ w1 + b1, 0.0)
    h2 = jnp.maximum(h1 @ w2 + b2, 0.0)
    return h2 @ w3 + b3


def packed_reference(x, P):
    """Pure-jnp reference using the SAME packed/quantized slab math as the kernel."""
    cdt = P.dtype
    f32 = jnp.float32
    h1 = jnp.maximum(
        jnp.dot(x.astype(cdt), P[0:INPUT_DIM, :], preferred_element_type=f32)
        + P[B1_ROW:B1_ROW + 1, :].astype(f32), 0.0)
    h2 = jnp.maximum(
        jnp.dot(h1.astype(cdt), P[W2_ROW:W2_ROW + PAD_HIDDEN, :],
                preferred_element_type=f32), 0.0)
    out = jnp.dot(h2.astype(cdt), P[W3_ROW:W3_ROW + PAD_HIDDEN, 0:OUT_LANES],
                  preferred_element_type=f32)
    return out[:, :OUTPUT_DIM]


if __name__ == "__main__":
    key = jax.random.PRNGKey(0)
    k_params, k_x = jax.random.split(key)

    params = init_params(k_params)
    packed = pack_params(params, dtype=jnp.bfloat16)

    # Single forward, batch = 8.
    batch = 8
    x = jax.random.normal(k_x, (batch, INPUT_DIM), dtype=jnp.float32)
    out = jax.block_until_ready(net_forward(x, packed))
    assert out.shape == (batch, OUTPUT_DIM)
    # Exact check vs. same-quantization reference, loose check vs. f32 spec.
    assert jnp.allclose(out, packed_reference(x, packed), atol=1e-4, rtol=1e-4), \
        "mismatch vs packed reference"
    assert jnp.allclose(out, reference_forward(x, params), atol=5e-2, rtol=5e-2), \
        "mismatch vs f32 spec reference"

    # Multi-chunk case: grid of 4 steps, weights DMA'd once and VMEM-resident.
    x_many = jax.random.normal(jax.random.PRNGKey(1), (32, INPUT_DIM), dtype=jnp.float32)
    out_many = jax.block_until_ready(net_forward(x_many, packed, block_rows=8))
    assert out_many.shape == (32, OUTPUT_DIM)
    assert jnp.allclose(out_many, packed_reference(x_many, packed), atol=1e-4, rtol=1e-4), \
        "mismatch vs packed reference (multi-chunk)"

    print("KERNEL_OK")
</pallas_src>

<mosaic_0001>
module attributes {stable_mosaic.version = 11 : i64} {
  func.func @_mlp_kernel(%arg0: i32, %arg1: memref<8x20xf32, #tpu.memory_space<vmem>>, %arg2: memref<536x256xbf16, #tpu.memory_space<vmem>>, %arg3: memref<8x128xf32, #tpu.memory_space<vmem>>) attributes {dimension_semantics = [#tpu.dimension_semantics<parallel>], iteration_bounds = array<i64: 1>, scalar_prefetch = 0 : i64, scratch_operands = 0 : i64, tpu.core_type = #tpu.core_type<tc>, window_params = [{transform_indices = @transform_0, window_bounds = array<i64: 8, 20>}, {pipeline_mode = #tpu.pipeline_mode<synchronous>, transform_indices = @transform_1, window_bounds = array<i64: 536, 256>}, {transform_indices = @transform_2, window_bounds = array<i64: 8, 128>}]} {
    %c0 = arith.constant 0 : index
    %c0_0 = arith.constant 0 : index
    %0 = vector.load %arg1[%c0, %c0_0] : memref<8x20xf32, #tpu.memory_space<vmem>>, vector<8x20xf32>
    %1 = arith.truncf %0 : vector<8x20xf32> to vector<8x20xbf16>
    %c0_1 = arith.constant 0 : index
    %c0_2 = arith.constant 0 : index
    %2 = vector.load %arg2[%c0_1, %c0_2] : memref<536x256xbf16, #tpu.memory_space<vmem>>, vector<20x256xbf16>
    %c20 = arith.constant 20 : index
    %c0_3 = arith.constant 0 : index
    %3 = vector.load %arg2[%c20, %c0_3] : memref<536x256xbf16, #tpu.memory_space<vmem>>, vector<1x256xbf16>
    %4 = arith.extf %3 : vector<1x256xbf16> to vector<1x256xf32>
    %cst = arith.constant dense<0.000000e+00> : vector<8x256xf32>
    %5 = tpu.matmul %1, %2, %cst {dimension_numbers = #tpu.dot_dimension_numbers<[1], [0], [0], [1], [0, 0, 1, 1], [], []>} : vector<8x20xbf16>, vector<20x256xbf16>, vector<8x256xf32> -> vector<8x256xf32>
    %6 = vector.broadcast %4 : vector<1x256xf32> to vector<8x256xf32>
    %7 = arith.addf %5, %6 : vector<8x256xf32>
    %cst_4 = arith.constant 0.000000e+00 : f32
    %8 = vector.broadcast %cst_4 : f32 to vector<8x256xf32>
    %9 = arith.maximumf %7, %8 : vector<8x256xf32>
    %c24 = arith.constant 24 : index
    %c0_5 = arith.constant 0 : index
    %10 = vector.load %arg2[%c24, %c0_5] : memref<536x256xbf16, #tpu.memory_space<vmem>>, vector<256x256xbf16>
    %11 = arith.truncf %9 : vector<8x256xf32> to vector<8x256xbf16>
    %cst_6 = arith.constant dense<0.000000e+00> : vector<8x256xf32>
    %12 = tpu.matmul %11, %10, %cst_6 {dimension_numbers = #tpu.dot_dimension_numbers<[1], [0], [0], [1], [0, 0, 1, 1], [], []>} : vector<8x256xbf16>, vector<256x256xbf16>, vector<8x256xf32> -> vector<8x256xf32>
    %cst_7 = arith.constant 0.000000e+00 : f32
    %13 = vector.broadcast %cst_7 : f32 to vector<8x256xf32>
    %14 = arith.maximumf %12, %13 : vector<8x256xf32>
    %c280 = arith.constant 280 : index
    %c0_8 = arith.constant 0 : index
    %15 = vector.load %arg2[%c280, %c0_8] : memref<536x256xbf16, #tpu.memory_space<vmem>>, vector<256x128xbf16>
    %16 = arith.truncf %14 : vector<8x256xf32> to vector<8x256xbf16>
    %cst_9 = arith.constant dense<0.000000e+00> : vector<8x128xf32>
    %17 = tpu.matmul %16, %15, %cst_9 {dimension_numbers = #tpu.dot_dimension_numbers<[1], [0], [0], [1], [0, 0, 1, 1], [], []>} : vector<8x256xbf16>, vector<256x128xbf16>, vector<8x128xf32> -> vector<8x128xf32>
    %c0_10 = arith.constant 0 : index
    %c0_11 = arith.constant 0 : index
    %18 = vector.load %arg3[%c0_10, %c0_11] : memref<8x128xf32, #tpu.memory_space<vmem>>, vector<8x128xf32>
    tpu.vector_store %arg3[%c0_10, %c0_11], %17 {strides = array<i32>} : memref<8x128xf32, #tpu.memory_space<vmem>>, vector<8x128xf32>,
    return
  }
  func.func @transform_0(%arg0: i32) -> (i32, i32) {
    %c0_i32 = arith.constant 0 : i32
    %c0_i32_0 = arith.constant 0 : i32
    return %arg0, %c0_i32 : i32, i32
  }
  func.func @transform_1(%arg0: i32) -> (i32, i32) {
    %c0_i32 = arith.constant 0 : i32
    %c0_i32_0 = arith.constant 0 : i32
    %c0_i32_1 = arith.constant 0 : i32
    return %c0_i32, %c0_i32_0 : i32, i32
  }
  func.func @transform_2(%arg0: i32) -> (i32, i32) {
    %c0_i32 = arith.constant 0 : i32
    %c0_i32_0 = arith.constant 0 : i32
    return %arg0, %c0_i32 : i32, i32
  }
}

</mosaic_0001>

<bundles_post_ra>
// kernel: tpu_custom_call.1
= control target key start
LH: loop header
LB: loop body
LE: loop exit
PB: predicated region body
PF: predicated region fallthrough
CT: control target
= control target key end

     0   :  { %7 = vsyncpa [#allocation3], 0  ;;  %s795_s0 = inlined_call_operand.hbm [shape: f32[8,20], index: 0, kind: input, shape index: {}]   ;;  %s796_s1 = inlined_call_operand.hbm [shape: bf16[536,256], index: 1, kind: input, shape index: {}]   ;;  %s797_s2 = inlined_call_operand.hbm [shape: f32[8,128], index: 2, kind: output, shape index: {}]  }
   0x1   :  { %8 = vsyncpa [#allocation6], 0 }
   0x2   :  { %9 = vsyncpa [#allocation4], 0  ;;  %s765_s9 = smov [#allocation2]   ;;  %s766_s11 = smov [#allocation5]  }
   0x3   :  { %s16_s10 = sshll.u32 %s765_s9, 4  ;;  %s25_s12 = sshll.u32 %s766_s11, 4  ;;  %s17_s10 = int_to_ptr.vmem [resolvable:$true] %s16_s10  ;;  %s26_s12 = int_to_ptr.vmem [resolvable:$true] %s25_s12 }
   0x4   :  { %s707_s13 = scalar_lea.vmem %s17_s10, 128  ;;  %p712_p1 = scmp.lt.s32.totalorder %s17_s10, %s17_s10 }
   0x5   :  { %p708_p0 = scmp.ne.s32.totalorder %s17_s10, %s707_s13  ;;  %p713_p2 = scmp.lt.s32.totalorder %s707_s13, %s707_s13 }
   0x7   :  { %p714_p3 = por %p713_p2, %p712_p1 }
   0x9   :  { %p715_p4 = pnand %p714_p3, %p708_p0 }
   0xb   :  { %718 = shalt.err (!%p715_p4)
}
   0xc   :  { %19 = dma.hbm_to_vmem [thread:$0]  %s795_s0, 128, %s17_s10, [#allocation3]  }
   0xd   :  { %s727_s16 = scalar_lea.vmem %s26_s12, 8576  ;;  %p732_p6 = scmp.lt.s32.totalorder %s26_s12, %s26_s12 }
   0xe   :  { %p728_p5 = scmp.ne.s32.totalorder %s26_s12, %s727_s16  ;;  %p733_p7 = scmp.lt.s32.totalorder %s727_s16, %s727_s16 }
  0x10   :  { %p734_p8 = por %p733_p7, %p732_p6 }
  0x12   :  { %p735_p9 = pnand %p734_p8, %p728_p5 }
  0x14   :  { %738 = shalt.err (!%p735_p9)
}
  0x15   :  { %s767_s17 = smov 128   ;;  %s768_s18 = smov 8  }
  0x16   :  { %31 = dma.hbm_to_vmem [thread:$0]  %s796_s1, 8576, %s26_s12, [#allocation6], %s767_s17, %s767_s17, %s768_s18  }
  0x17   :  { %759 = dma.done.wait [#allocation3], 128  }
  0x18   :  { %760 = vsyncadd [#allocation3], 4294967168 }
  0x19   :  { %761 = dma.done.wait [#allocation6], 8576  }
  0x1a   :  { %762 = vsyncadd [#allocation6], 4294958720  ;;  %v769_v0 = vmov 0   ;;  %v43_v1 = vld [vmem:[#allocation5 + $0x10] sm:$0x33]  ;;  %vm74_vm0 = vcmask 1041408   ;;  %v47_v53 = vlaneseq }
  0x1b   :  { %113 = vmatprep.mubr.bf16.mxu0 %v769_v0  ;;  %v551_v2 = vcombine.high %v43_v1, %v43_v1  ;;  %v550_v3 = vcombine.low %v43_v1, %v43_v1  ;;  %v632_v4 = vld [vmem:[#allocation5 + $0x4] ss:$8 sps:$4 sm:$0xff]   ;;  %v634_v5 = vld [vmem:[#allocation5] ss:$8 sps:$4 sm:$0xff]   ;;  %v39_v9 = vld [vmem:[#allocation2] sm:$0xff]  ;;  %vm70_vm1 = vcmask 162816  }
  0x1c   :  { %v635_v6 = vld [vmem:[#allocation5 + $0x8c] ss:$8 sps:$4 sm:$0xff]   ;;  %v637_v8 = vld [vmem:[#allocation5 + $0x88] ss:$8 sps:$4 sm:$0xff]   ;;  %v638_v10 = vld [vmem:[#allocation5 + $0x7c] ss:$8 sps:$4 sm:$0xff]   ;;  %v40_v13 = vpack.c.bf16 %v39_v9, %v39_v9 }
  0x1d   :  { %552 = vmatprep.subr.msk.bf16.mxu0 %vm74_vm0, %v551_v2  ;;  %v76_v7 = vsel %vm74_vm0, %v550_v3, 0  ;;  %318 = vmatprep.subr.bf16.mxu1 %v635_v6  ;;  %v640_v11 = vld [vmem:[#allocation5 + $0x78] ss:$8 sps:$4 sm:$0xff]   ;;  %v641_v12 = vld [vmem:[#allocation5 + $0x6c] ss:$8 sps:$4 sm:$0xff]   ;;  %v48_v54 = vshrl.u32 %v47_v53, 7 }
  0x1e   :  { %94 = vmatpush1.bf16.msra.mxu0 %v76_v7  ;;  %319 = vmatpush1.bf16.msra.mxu1 %v637_v8  ;;  %v643_v14 = vld [vmem:[#allocation5 + $0x68] ss:$8 sps:$4 sm:$0xff]   ;;  %v644_v15 = vld [vmem:[#allocation5 + $0x5c] ss:$8 sps:$4 sm:$0xff]   ;;  %v646_v16 = vld [vmem:[#allocation5 + $0x58] ss:$8 sps:$4 sm:$0xff]  }
  0x1f   :  { %95 = vmatprep.subr.bf16.mxu0 %v632_v4  ;;  %320 = vmatprep.subr.bf16.mxu1 %v638_v10  ;;  %v647_v17 = vld [vmem:[#allocation5 + $0x4c] ss:$8 sps:$4 sm:$0xff]   ;;  %v649_v18 = vld [vmem:[#allocation5 + $0x48] ss:$8 sps:$4 sm:$0xff]   ;;  %v650_v19 = vld [vmem:[#allocation5 + $0x3c] ss:$8 sps:$4 sm:$0xff]  }
  0x20   :  { %v652_v20 = vld [vmem:[#allocation5 + $0x38] ss:$8 sps:$4 sm:$0xff]   ;;  %v653_v21 = vld [vmem:[#allocation5 + $0x2c] ss:$8 sps:$4 sm:$0xff]   ;;  %v655_v22 = vld [vmem:[#allocation5 + $0x28] ss:$8 sps:$4 sm:$0xff]  }
  0x21   :  { %v656_v23 = vld [vmem:[#allocation5 + $0x1c] ss:$8 sps:$4 sm:$0xff]   ;;  %v658_v24 = vld [vmem:[#allocation5 + $0x18] ss:$8 sps:$4 sm:$0xff]   ;;  %v659_v25 = vld [vmem:[#allocation5 + $0x10c] ss:$8 sps:$4 sm:$0xff]  }
  0x22   :  { %96 = vmatpush1.bf16.msra.mxu0 %v634_v5  ;;  %321 = vmatpush1.bf16.msra.mxu1 %v640_v11  ;;  %v661_v26 = vld [vmem:[#allocation5 + $0x108] ss:$8 sps:$4 sm:$0xff]   ;;  %v662_v27 = vld [vmem:[#allocation5 + $0xfc] ss:$8 sps:$4 sm:$0xff]   ;;  %v664_v28 = vld [vmem:[#allocation5 + $0xf8] ss:$8 sps:$4 sm:$0xff]  }
  0x23   :  { %322 = vmatprep.subr.bf16.mxu1 %v641_v12  ;;  %v665_v29 = vld [vmem:[#allocation5 + $0xec] ss:$8 sps:$4 sm:$0xff]   ;;  %v667_v30 = vld [vmem:[#allocation5 + $0xe8] ss:$8 sps:$4 sm:$0xff]   ;;  %v668_v31 = vld [vmem:[#allocation5 + $0xdc] ss:$8 sps:$4 sm:$0xff]  }
  0x24   :  { %v670_v32 = vld [vmem:[#allocation5 + $0xd8] ss:$8 sps:$4 sm:$0xff]   ;;  %v671_v33 = vld [vmem:[#allocation5 + $0xcc] ss:$8 sps:$4 sm:$0xff]   ;;  %v673_v34 = vld [vmem:[#allocation5 + $0xc8] ss:$8 sps:$4 sm:$0xff]  }
  0x25   :  { %553 = vmatmul.mubr.msk.bf16.vlgmr.msra.gmra.mxu0 %vm70_vm1, %v40_v13  ;;  %v674_v35 = vld [vmem:[#allocation5 + $0xbc] ss:$8 sps:$4 sm:$0xff]   ;;  %v676_v36 = vld [vmem:[#allocation5 + $0xb8] ss:$8 sps:$4 sm:$0xff]   ;;  %v677_v37 = vld [vmem:[#allocation5 + $0xac] ss:$8 sps:$4 sm:$0xff]  }
  0x26   :  { %323 = vmatpush1.bf16.msra.mxu1 %v643_v14  ;;  %v679_v38 = vld [vmem:[#allocation5 + $0xa8] ss:$8 sps:$4 sm:$0xff]   ;;  %v680_v39 = vld [vmem:[#allocation5 + $0x9c] ss:$8 sps:$4 sm:$0xff]   ;;  %v682_v40 = vld [vmem:[#allocation5 + $0x98] ss:$8 sps:$4 sm:$0xff]  }
  0x27   :  { %324 = vmatprep.subr.bf16.mxu1 %v644_v15  ;;  %v683_v41 = vld [vmem:[#allocation5 + $0x208] ss:$8 sps:$4 sm:$0xff]   ;;  %v685_v43 = vld [vmem:[#allocation5 + $0x1f8] ss:$8 sps:$4 sm:$0xff]   ;;  %v49_v57 = vsub.s32 4, %v48_v54  ;;  %s770_s0 = smov [#allocation7]  }
  0x28   :  { %v684_v42 = vld [vmem:[#allocation5 + $0x188] ss:$8 sps:$4 sm:$0xff]   ;;  %602 = vmatprep.subr.bf16.mxu0 %v683_v41  ;;  %v686_v44 = vld [vmem:[#allocation5 + $0x178] ss:$8 sps:$4 sm:$0xff]   ;;  %s538_s1 = sshll.u32 %s770_s0, 4  ;;  %s539_s1 = int_to_ptr.vmem [resolvable:$true] %s538_s1 }
  0x29   :  { %603 = vmatpush3.bf16.msra.mxu0 %v684_v42  ;;  %v687_v45 = vld [vmem:[#allocation5 + $0x1e8] ss:$8 sps:$4 sm:$0xff]   ;;  %v689_v47 = vld [vmem:[#allocation5 + $0x1d8] ss:$8 sps:$4 sm:$0xff]   ;;  %s739_s21 = scalar_lea.vmem %s539_s1, 128  ;;  %p744_p11 = scmp.lt.s32.totalorder %s539_s1, %s539_s1 }
  0x2a   :  { %325 = vmatpush1.bf16.msra.mxu1 %v646_v16  ;;  %604 = vmatprep.subr.bf16.mxu0 %v685_v43  ;;  %v688_v46 = vld [vmem:[#allocation5 + $0x168] ss:$8 sps:$4 sm:$0xff]   ;;  %v690_v48 = vld [vmem:[#allocation5 + $0x158] ss:$8 sps:$4 sm:$0xff]   ;;  %p740_p10 = scmp.ne.s32.totalorder %s539_s1, %s739_s21  ;;  %p745_p12 = scmp.lt.s32.totalorder %s739_s21, %s739_s21 }
  0x2b   :  { %326 = vmatprep.subr.bf16.mxu1 %v647_v17  ;;  %v691_v49 = vld [vmem:[#allocation5 + $0x1c8] ss:$8 sps:$4 sm:$0xff]   ;;  %v693_v51 = vld [vmem:[#allocation5 + $0x1b8] ss:$8 sps:$4 sm:$0xff]  }
  0x2c   :  { %v692_v50 = vld [vmem:[#allocation5 + $0x148] ss:$8 sps:$4 sm:$0xff]   ;;  %v694_v52 = vld [vmem:[#allocation5 + $0x138] ss:$8 sps:$4 sm:$0xff]   ;;  %p746_p13 = por %p745_p12, %p744_p11 }
  0x2d   :  { %605 = vmatpush3.bf16.msra.mxu0 %v686_v44  ;;  %v44_v55 = vld [vmem:[#allocation5 + $0x10] sm:$0x44]  ;;  %v697_v9 = vld [vmem:[#allocation5 + $0x198] ss:$8 sps:$4 sm:$0xff]  }
  0x2e   :  { %327 = vmatpush1.bf16.msra.mxu1 %v649_v18  ;;  %606 = vmatprep.subr.bf16.mxu0 %v687_v45  ;;  %v45_v56 = vunpack.c.l.bf16 %v44_v55  ;;  %v46_v58 = vunpack.c.h.bf16 %v44_v55  ;;  %v695_v7 = vld [vmem:[#allocation5 + $0x1a8] ss:$8 sps:$4 sm:$0xff]   ;;  %v698_v10 = vld [vmem:[#allocation5 + $0x118] ss:$8 sps:$4 sm:$0xff]   ;;  %p747_p0 = pnand %p746_p13, %p740_p10 }
  0x2f   :  { %328 = vmatprep.subr.bf16.mxu1 %v650_v19  ;;  %v696_v8 = vld [vmem:[#allocation5 + $0x128] ss:$8 sps:$4 sm:$0xff]  }
  0x30   :  { %v50_v59 = vrot.slane %v45_v56, %v49_v57  ;;  %v54_v60 = vrot.slane %v46_v58, %v49_v57 }
  0x31   :  { %607 = vmatpush3.bf16.msra.mxu0 %v688_v46 }
  0x32   :  { %329 = vmatpush1.bf16.msra.mxu1 %v652_v20  ;;  %608 = vmatprep.subr.bf16.mxu0 %v689_v47 }
  0x33   :  { %330 = vmatprep.subr.bf16.mxu1 %v653_v21 }
  0x35   :  { %609 = vmatpush3.bf16.msra.mxu0 %v690_v48 }
  0x36   :  { %331 = vmatpush1.bf16.msra.mxu1 %v655_v22  ;;  %610 = vmatprep.subr.bf16.mxu0 %v691_v49 }
  0x37   :  { %332 = vmatprep.subr.bf16.mxu1 %v656_v23 }
  0x39   :  { %611 = vmatpush3.bf16.msra.mxu0 %v692_v50 }
  0x3a   :  { %333 = vmatpush1.bf16.msra.mxu1 %v658_v24  ;;  %612 = vmatprep.subr.bf16.mxu0 %v693_v51 }
  0x3b   :  { %334 = vmatprep.subr.bf16.mxu1 %v659_v25 }
  0x3d   :  { %613 = vmatpush3.bf16.msra.mxu0 %v694_v52 }
  0x3e   :  { %335 = vmatpush2.bf16.msra.mxu1 %v661_v26  ;;  %614 = vmatprep.subr.bf16.mxu0 %v695_v7 }
  0x3f   :  { %336 = vmatprep.subr.bf16.mxu1 %v662_v27 }
  0x41   :  { %615 = vmatpush3.bf16.msra.mxu0 %v696_v8 }
  0x42   :  { %337 = vmatpush2.bf16.msra.mxu1 %v664_v28  ;;  %616 = vmatprep.subr.bf16.mxu0 %v697_v9 }
  0x43   :  { %338 = vmatprep.subr.bf16.mxu1 %v665_v29 }
  0x45   :  { %617 = vmatpush3.bf16.msra.mxu0 %v698_v10 }
  0x46   :  { %339 = vmatpush2.bf16.msra.mxu1 %v667_v30 }
  0x47   :  { %340 = vmatprep.subr.bf16.mxu1 %v668_v31 }
  0x4a   :  { %341 = vmatpush2.bf16.msra.mxu1 %v670_v32 }
  0x4b   :  { %342 = vmatprep.subr.bf16.mxu1 %v671_v33 }
  0x4e   :  { %343 = vmatpush2.bf16.msra.mxu1 %v673_v34 }
  0x4f   :  { %344 = vmatprep.subr.bf16.mxu1 %v674_v35 }
  0x52   :  { %345 = vmatpush2.bf16.msra.mxu1 %v676_v36 }
  0x53   :  { %346 = vmatprep.subr.bf16.mxu1 %v677_v37 }
  0x56   :  { %347 = vmatpush2.bf16.msra.mxu1 %v679_v38 }
  0x57   :  { %348 = vmatprep.subr.bf16.mxu1 %v680_v39 }
  0x5a   :  { %349 = vmatpush2.bf16.msra.mxu1 %v682_v40 }
  0xe5   :  { %v115_v61 = vpop.f32.mrf.mxu0 }
  0xe6   :  { %v116_v62 = vadd.f32 %v115_v61, %v50_v59 }
  0xe7   :  { %v117_v63 = vpop.f32.mrf.mxu0 }
  0xe8   :  { %v118_v0 = vadd.f32 %v117_v63, %v54_v60  ;;  %v122_v1 = vmax.f32 %v116_v62, 0.0 }
  0xe9   :  { %v119_v2 = vpop.f32.mrf.mxu0 }
  0xea   :  { %v123_v3 = vmax.f32 %v118_v0, 0.0  ;;  %v156_v6 = vpack.c.bf16 %v122_v1, %v122_v1 }
  0xeb   :  { %v120_v4 = vpop.f32.mrf.mxu0 }
  0xec   :  { %v157_v5 = vpack.c.bf16 %v123_v3, %v123_v3 }
  0xee   :  { %350 = vmatprep.mubr.bf16.mxu1 %v157_v5 }
  0xef   :  { %351 = vmatmul.mubr.bf16.vlgmr.msra.gmra.mxu1 %v156_v6 }
 0x1af   :  { %v352_v11 = vpop.f32.mrf.mxu1 }
 0x1b0   :  { %v359_v12 = vmax.f32 %v352_v11, 0.0 }
 0x1b1   :  { %v354_v13 = vpop.f32.mrf.mxu1 }
 0x1b2   :  { %v360_v14 = vmax.f32 %v354_v13, 0.0  ;;  %v393_v17 = vpack.c.bf16 %v359_v12, %v359_v12 }
 0x1b3   :  { %v356_v15 = vpop.f32.mrf.mxu1 }
 0x1b4   :  { %v394_v16 = vpack.c.bf16 %v360_v14, %v360_v14 }
 0x1b5   :  { %v357_v18 = vpop.f32.mrf.mxu1 }
 0x1b6   :  { %523 = vmatprep.mubr.bf16.mxu0 %v394_v16 }
 0x1b7   :  { %524 = vmatmul.mubr.bf16.vlgmr.msra.gmra.mxu0 %v393_v17 }
 0x277   :  { %v618_v19 = vpop.f32.mrf.mxu0 }
 0x279   :  { %v619_v20 = vpop.f32.mrf.mxu0 }
 0x27a   :  { %v620_v21 = vadd.f32 %v619_v20, %v618_v19 }
 0x27b   :  { %v621_v22 = vpop.f32.mrf.mxu0 }
 0x27c   :  { %531 = vst [vmem:[#allocation7] sm:$0xff] %v620_v21 }
 0x27d   :  { %v622_v23 = vpop.f32.mrf.mxu0 }
 0x27e   :  { %750 = shalt.err (!%p747_p0)
}
 0x27f   :  { %541 = dma.vmem_to_hbm [thread:$0]  %s539_s1, 128, %s797_s2, [#allocation4]  }
 0x280   :  { %763 = dma.done.wait [#allocation4], 128  }
 0x281   :  { %764 = vsyncadd [#allocation4], 4294967168 }
 0x282   :  { %545 = vsyncpa [#allocation3], 1 }
 0x283   :  { %546 = vsyncpa [#allocation6], 1 }
 0x284   :  { %547 = vsyncpa [#allocation4], 1 }

</bundles_post_ra>
